<compile_context>
chip_gen: v6e
topology: v6e:2x2x1
jax: 0.10.0
libtpu: 0.0.40
codegen_flags: <defaults>
</compile_context>

<pallas_src>
import jax
import jax.numpy as jnp
from jax.experimental import pallas as pl
from jax.experimental.pallas import tpu as pltpu


# ---------------------------------------------------------------------------
# Kernels
# ---------------------------------------------------------------------------

def _ca_kernel_spatial_lanes(x_ref, w1_ref, w2_ref, o_ref):
    """x_ref: (Bt, C, HW) -- flattened spatial axis on lanes (HW % 128 == 0)."""
    x = x_ref[...]                                      # native dtype, no f32 copy
    bt, c, hw = x.shape

    # Global average pool over the lane (spatial) axis, f32 accumulation.
    y = jnp.sum(x, axis=-1, dtype=jnp.float32) * (1.0 / hw)          # (Bt, C)

    # fc1 -> ReLU -> fc2 -> sigmoid (tiny MXU matmuls, f32 accumulate).
    h = jnp.maximum(
        jnp.dot(y, w1_ref[...], preferred_element_type=jnp.float32), 0.0)
    s = jax.nn.sigmoid(
        jnp.dot(h, w2_ref[...], preferred_element_type=jnp.float32))  # (Bt, C)

    # Per-channel scale in the input's native dtype (broadcast over lanes).
    o_ref[...] = (x * s.astype(x.dtype)[:, :, None]).astype(o_ref.dtype)


def _ca_kernel_channel_lanes(x_ref, w1_ref, w2_ref, o_ref):
    """x_ref: (Bt, HW, C) -- channels on lanes (C % 128 == 0, small HW)."""
    bt, hw, c = x_ref.shape
    inv_hw = 1.0 / hw

    # Pool each batch element with plain 2-D ops (sublane reduce, f32 accum).
    rows = []
    for b in range(bt):                    # bt is a small static constant
        xb = x_ref[b]                      # (HW, C), native dtype
        rows.append(
            jnp.sum(xb, axis=0, keepdims=True, dtype=jnp.float32) * inv_hw)
    y = rows[0] if bt == 1 else jnp.concatenate(rows, axis=0)         # (Bt, C)

    h = jnp.maximum(
        jnp.dot(y, w1_ref[...], preferred_element_type=jnp.float32), 0.0)
    s = jax.nn.sigmoid(
        jnp.dot(h, w2_ref[...], preferred_element_type=jnp.float32))  # (Bt, C)

    # Scale: lane-dense, unmasked stores; broadcast s over the sublane axis.
    for b in range(bt):
        xb = x_ref[b]                                   # (HW, C)
        sb = s[b:b + 1, :].astype(xb.dtype)             # (1, C)
        o_ref[b] = (xb * sb).astype(o_ref.dtype)


# ---------------------------------------------------------------------------
# Wrapper
# ---------------------------------------------------------------------------

def channel_attention(x, w1, w2, *, block_budget_bytes=6 << 20):
    """SE channel attention. x: (B, C, H, W); w1: (C//r, C); w2: (C, C//r)."""
    B, C, H, W = x.shape
    HW = H * W
    Ch, C_in = w1.shape
    assert C_in == C and w2.shape == (C, Ch)

    # ---- layout: make the lane (last) axis the dense one --------------------
    spatial_on_lanes = (HW % 128 == 0) or (C % 128 != 0 and HW >= C)

    # ---- batch tile: biggest Bt whose block stays inside the VMEM budget ----
    itemsize = jnp.dtype(x.dtype).itemsize
    elem_bytes = C * HW * itemsize
    bt = max(1, min(B, block_budget_bytes // max(elem_bytes, 1)))
    if not spatial_on_lanes:
        bt = min(bt, 8)                  # channel-lanes kernel unrolls over Bt
    while B % bt:                        # keep the grid exact (no padded blocks)
        bt -= 1

    block_bytes = bt * elem_bytes
    w_bytes = (w1.size + w2.size) * jnp.dtype(w1.dtype).itemsize
    # 2x-in + 2x-out double buffers + a block-sized temp + weights + slack.
    vmem_limit = int(min(max(5 * block_bytes + 2 * w_bytes + (4 << 20),
                             32 << 20), 64 << 20))
    # TODO(synk): if a single (C, HW) element exceeds the v7x budget
    # (block_bytes > ~12 MiB), split into a pool kernel + HW-tiled scale kernel.

    w1_t = jnp.transpose(w1)             # (C, Ch)
    w2_t = jnp.transpose(w2)             # (Ch, C)

    if spatial_on_lanes:
        x_in = x.reshape(B, C, HW)                         # free reshape
        block = (bt, C, HW)
        kernel = _ca_kernel_spatial_lanes
    else:
        # NHWC-style slab so stores are lane-dense when C % 128 == 0 and HW is
        # small; in a real NHWC pipeline this transpose would not exist.
        x_in = jnp.transpose(x.reshape(B, C, HW), (0, 2, 1))   # (B, HW, C)
        block = (bt, HW, C)
        kernel = _ca_kernel_channel_lanes

    out = pl.pallas_call(
        kernel,
        out_shape=jax.ShapeDtypeStruct(x_in.shape, x.dtype),
        grid_spec=pltpu.PrefetchScalarGridSpec(
            num_scalar_prefetch=0,
            grid=(B // bt,),
            in_specs=[
                pl.BlockSpec(block, lambda b: (b, 0, 0)),
                pl.BlockSpec((C, Ch), lambda b: (0, 0)),
                pl.BlockSpec((Ch, C), lambda b: (0, 0)),
            ],
            out_specs=pl.BlockSpec(block, lambda b: (b, 0, 0)),
        ),
        compiler_params=pltpu.CompilerParams(
            dimension_semantics=("parallel",),
            vmem_limit_bytes=vmem_limit,
        ),
    )(x_in, w1_t, w2_t)

    if spatial_on_lanes:
        return out.reshape(B, C, H, W)
    return jnp.transpose(out, (0, 2, 1)).reshape(B, C, H, W)


# ---------------------------------------------------------------------------
# Pure-JAX reference matching the PyTorch module
# ---------------------------------------------------------------------------

def channel_attention_ref(x, w1, w2):
    y = jnp.mean(x, axis=(2, 3))                         # (B, C)
    h = jnp.maximum(y @ w1.T, 0.0)                       # (B, C/ratio)
    s = jax.nn.sigmoid(h @ w2.T)                         # (B, C)
    return x * s[:, :, None, None]


# ---------------------------------------------------------------------------
# Self-test
# ---------------------------------------------------------------------------

if __name__ == "__main__":
    key = jax.random.PRNGKey(0)

    def run_case(B, C, H, W, ratio, case_key):
        Ch = C // ratio
        kx, k1, k2 = jax.random.split(case_key, 3)
        x = jax.random.normal(kx, (B, C, H, W), dtype=jnp.float32)
        # PyTorch Linear weight layout: (out_features, in_features).
        w1 = jax.random.normal(k1, (Ch, C), dtype=jnp.float32) / jnp.sqrt(C)
        w2 = jax.random.normal(k2, (C, Ch), dtype=jnp.float32) / jnp.sqrt(Ch)

        out = jax.block_until_ready(channel_attention(x, w1, w2))
        ref = channel_attention_ref(x, w1, w2)
        assert out.shape == (B, C, H, W)
        err = float(jnp.max(jnp.abs(out - ref)))
        assert jnp.allclose(out, ref, atol=1e-4, rtol=1e-4), err

    # Module defaults (in_planes=64, ratio=2); HW=256 -> spatial-on-lanes path.
    run_case(2, 64, 16, 16, 2, jax.random.fold_in(key, 0))
    # Deep-layer shape: C=128, 7x7 spatial; HW=49 -> channel-on-lanes path.
    run_case(2, 128, 7, 7, 2, jax.random.fold_in(key, 1))

    print("KERNEL_OK")
</pallas_src>

<mosaic_0001>
module attributes {stable_mosaic.version = 11 : i64} {
  func.func @_ca_kernel_spatial_lanes(%arg0: i32, %arg1: memref<2x64x256xf32, #tpu.memory_space<vmem>>, %arg2: memref<64x32xf32, #tpu.memory_space<vmem>>, %arg3: memref<32x64xf32, #tpu.memory_space<vmem>>, %arg4: memref<2x64x256xf32, #tpu.memory_space<vmem>>) attributes {dimension_semantics = [#tpu.dimension_semantics<parallel>], iteration_bounds = array<i64: 1>, scalar_prefetch = 0 : i64, scratch_operands = 0 : i64, tpu.core_type = #tpu.core_type<tc>, window_params = [{transform_indices = @transform_0, window_bounds = array<i64: 2, 64, 256>}, {pipeline_mode = #tpu.pipeline_mode<synchronous>, transform_indices = @transform_1, window_bounds = array<i64: 64, 32>}, {pipeline_mode = #tpu.pipeline_mode<synchronous>, transform_indices = @transform_2, window_bounds = array<i64: 32, 64>}, {transform_indices = @transform_3, window_bounds = array<i64: 2, 64, 256>}]} {
    %c0 = arith.constant 0 : index
    %c0_0 = arith.constant 0 : index
    %c0_1 = arith.constant 0 : index
    %0 = vector.load %arg1[%c0, %c0_0, %c0_1] : memref<2x64x256xf32, #tpu.memory_space<vmem>>, vector<2x64x256xf32>
    %cst = arith.constant dense<0.000000e+00> : vector<2x64xf32>
    %1 = vector.multi_reduction <add>, %0, %cst [2] : vector<2x64x256xf32> to vector<2x64xf32>
    %cst_2 = arith.constant 3.906250e-03 : f32
    %2 = vector.broadcast %cst_2 : f32 to vector<2x64xf32>
    %3 = arith.mulf %1, %2 : vector<2x64xf32>
    %c0_3 = arith.constant 0 : index
    %c0_4 = arith.constant 0 : index
    %4 = vector.load %arg2[%c0_3, %c0_4] : memref<64x32xf32, #tpu.memory_space<vmem>>, vector<64x32xf32>
    %cst_5 = arith.constant dense<0.000000e+00> : vector<2x32xf32>
    %5 = tpu.matmul %3, %4, %cst_5 {dimension_numbers = #tpu.dot_dimension_numbers<[1], [0], [0], [1], [0, 0, 1, 1], [], []>} : vector<2x64xf32>, vector<64x32xf32>, vector<2x32xf32> -> vector<2x32xf32>
    %cst_6 = arith.constant 0.000000e+00 : f32
    %6 = vector.broadcast %cst_6 : f32 to vector<2x32xf32>
    %7 = arith.maximumf %5, %6 : vector<2x32xf32>
    %c0_7 = arith.constant 0 : index
    %c0_8 = arith.constant 0 : index
    %8 = vector.load %arg3[%c0_7, %c0_8] : memref<32x64xf32, #tpu.memory_space<vmem>>, vector<32x64xf32>
    %cst_9 = arith.constant dense<0.000000e+00> : vector<2x64xf32>
    %9 = tpu.matmul %7, %8, %cst_9 {dimension_numbers = #tpu.dot_dimension_numbers<[1], [0], [0], [1], [0, 0, 1, 1], [], []>} : vector<2x32xf32>, vector<32x64xf32>, vector<2x64xf32> -> vector<2x64xf32>
    %10 = arith.negf %9 : vector<2x64xf32>
    %11 = math.exp %10 : vector<2x64xf32>
    %cst_10 = arith.constant 1.000000e+00 : f32
    %12 = vector.broadcast %cst_10 : f32 to vector<2x64xf32>
    %13 = arith.addf %12, %11 : vector<2x64xf32>
    %14 = arith.divf %12, %13 : vector<2x64xf32>
    %15 = vector.shape_cast %14 : vector<2x64xf32> to vector<2x64x1xf32>
    %16 = vector.broadcast %15 : vector<2x64x1xf32> to vector<2x64x256xf32>
    %17 = arith.mulf %0, %16 : vector<2x64x256xf32>
    %c0_11 = arith.constant 0 : index
    %c0_12 = arith.constant 0 : index
    %c0_13 = arith.constant 0 : index
    %18 = vector.load %arg4[%c0_11, %c0_12, %c0_13] : memref<2x64x256xf32, #tpu.memory_space<vmem>>, vector<2x64x256xf32>
    tpu.vector_store %arg4[%c0_11, %c0_12, %c0_13], %17 {strides = array<i32>} : memref<2x64x256xf32, #tpu.memory_space<vmem>>, vector<2x64x256xf32>,
    return
  }
  func.func @transform_0(%arg0: i32) -> (i32, i32, i32) {
    %c0_i32 = arith.constant 0 : i32
    %c0_i32_0 = arith.constant 0 : i32
    %c0_i32_1 = arith.constant 0 : i32
    return %arg0, %c0_i32, %c0_i32_0 : i32, i32, i32
  }
  func.func @transform_1(%arg0: i32) -> (i32, i32) {
    %c0_i32 = arith.constant 0 : i32
    %c0_i32_0 = arith.constant 0 : i32
    %c0_i32_1 = arith.constant 0 : i32
    return %c0_i32, %c0_i32_0 : i32, i32
  }
  func.func @transform_2(%arg0: i32) -> (i32, i32) {
    %c0_i32 = arith.constant 0 : i32
    %c0_i32_0 = arith.constant 0 : i32
    %c0_i32_1 = arith.constant 0 : i32
    return %c0_i32, %c0_i32_0 : i32, i32
  }
  func.func @transform_3(%arg0: i32) -> (i32, i32, i32) {
    %c0_i32 = arith.constant 0 : i32
    %c0_i32_0 = arith.constant 0 : i32
    %c0_i32_1 = arith.constant 0 : i32
    return %arg0, %c0_i32, %c0_i32_0 : i32, i32, i32
  }
}

</mosaic_0001>

<bundles_post_ra>
// kernel: tpu_custom_call.1
= control target key start
LH: loop header
LB: loop body
LE: loop exit
PB: predicated region body
PF: predicated region fallthrough
CT: control target
= control target key end

     0   :  { %8 = vsyncpa [#allocation3], 0  ;;  %s895_s0 = inlined_call_operand.hbm [shape: f32[2,64,256], index: 0, kind: input, shape index: {}]   ;;  %s896_s1 = inlined_call_operand.vmem [shape: f32[64,32], index: 1, kind: input, shape index: {}]   ;;  %s897_s2 = inlined_call_operand.vmem [shape: f32[32,64], index: 2, kind: input, shape index: {}]   ;;  %s898_s3 = inlined_call_operand.hbm [shape: f32[2,64,256], index: 3, kind: output, shape index: {}]  }
   0x1   :  { %9 = vsyncpa [#allocation4], 0  ;;  %s655_s12 = smov [#allocation2]  }
   0x2   :  { %s15_s13 = sshll.u32 %s655_s12, 4  ;;  %s16_s13 = int_to_ptr.vmem [resolvable:$true] %s15_s13 }
   0x3   :  { %s619_s14 = scalar_lea.vmem %s16_s13, 4096  ;;  %p624_p1 = scmp.lt.s32.totalorder %s16_s13, %s16_s13 }
   0x4   :  { %p620_p0 = scmp.ne.s32.totalorder %s16_s13, %s619_s14  ;;  %p625_p2 = scmp.lt.s32.totalorder %s619_s14, %s619_s14 }
   0x6   :  { %p626_p3 = por %p625_p2, %p624_p1 }
   0x8   :  { %p627_p4 = pnand %p626_p3, %p620_p0 }
   0xa   :  { %630 = shalt.err (!%p627_p4)
}
   0xb   :  { %s656_s15 = smov 256   ;;  %s657_s16 = smov 16  }
   0xc   :  { %21 = dma.hbm_to_vmem [thread:$0]  %s895_s0, 4096, %s16_s13, [#allocation3], %s656_s15, %s656_s15, %s657_s16  }
   0xd   :  { %651 = dma.done.wait [#allocation3], 4096  }
   0xe   :  { %652 = vsyncadd [#allocation3], 4294963200  ;;  %v687_v0 = vld [vmem:[#allocation2 + $0x80] sm:$0xff]  ;;  %v689_v1 = vld [vmem:[#allocation2 + $0x88] sm:$0xff]  ;;  %v899_v48 = vmov 0.0   ;;  %vm659_vm0 = vmmov 0   ;;  %v149_v63 = vlaneseq }
   0xf   :  { %v691_v2 = vld [vmem:[#allocation2] sm:$0xff]  ;;  %v85_v3 = vadd.f32 %v689_v1, %v687_v0  ;;  %v695_v4 = vld [vmem:[#allocation2 + $0x8] sm:$0xff]  ;;  %v697_v5 = vld [vmem:[#allocation2 + $0x90] sm:$0xff]  ;;  %571 = vmatprep.subr.mxu0 %v899_v48  ;;  %590 = vmatprep.subr.mxu1 %v899_v48  ;;  %vm160_vm1 = vcmask 130112   ;;  %vm167_vm2 = vcmask 195712   ;;  %vm174_vm3 = vcmask 261312  }
  0x10   :  { %v699_v6 = vld [vmem:[#allocation2 + $0x98] sm:$0xff]  ;;  %v61_v7 = vadd.f32 %v695_v4, %v691_v2  ;;  %v703_v8 = vld [vmem:[#allocation2 + $0x10] sm:$0xff]  ;;  %v711_v12 = vld [vmem:[#allocation2 + $0xa0] sm:$0xff]  ;;  %587 = vmatprep.mubr.msk.f32.mxu0 %vm659_vm0, %v899_v48  ;;  %598 = vmatprep.mubr.msk.f32.mxu1 %vm659_vm0, %v899_v48  ;;  %vm181_vm4 = vcmask 326912   ;;  %vm188_vm5 = vcmask 392512   ;;  %vm195_vm6 = vcmask 458112  }
  0x11   :  { %v705_v9 = vld [vmem:[#allocation2 + $0x18] sm:$0xff]  ;;  %86 = vadd.xlane.f32.xlu1 %v85_v3  ;;  %v88_v10 = vadd.f32 %v699_v6, %v697_v5  ;;  %v713_v13 = vld [vmem:[#allocation2 + $0xa8] sm:$0xff]  ;;  %v715_v14 = vld [vmem:[#allocation2 + $0x20] sm:$0xff]  ;;  %vm202_vm7 = vcmask 523712   ;;  %vm243_vm8 = vcmask 1041409   ;;  %vm245_vm9 = vcmask 523264  }
  0x12   :  { %62 = vadd.xlane.f32.xlu0 %v61_v7  ;;  %v64_v11 = vadd.f32 %v705_v9, %v703_v8  ;;  %v717_v15 = vld [vmem:[#allocation2 + $0x28] sm:$0xff]  ;;  %v91_v16 = vadd.f32 %v713_v13, %v711_v12  ;;  %v723_v18 = vld [vmem:[#allocation2 + $0xb0] sm:$0xff]  ;;  %v725_v19 = vld [vmem:[#allocation2 + $0xb8] sm:$0xff]  ;;  %vm323_vm10 = vcmask 261120  }
  0x13   :  { %v67_v17 = vadd.f32 %v717_v15, %v715_v14  ;;  %907 = vst [vmem:[#allocation8_spill] sm:$0xff] %v725_v19  ;;  %v727_v20 = vld [vmem:[#allocation2 + $0x30] sm:$0xff]  ;;  %v729_v21 = vld [vmem:[#allocation2 + $0x38] sm:$0xff]  ;;  %v94_v22 = vadd.f32 %v725_v19, %v723_v18  ;;  %v735_v24 = vld [vmem:[#allocation2 + $0xc0] sm:$0xff] }
  0x14   :  { %v70_v23 = vadd.f32 %v729_v21, %v727_v20  ;;  %v737_v25 = vld [vmem:[#allocation2 + $0xc8] sm:$0xff]  ;;  %v739_v26 = vld [vmem:[#allocation2 + $0x40] sm:$0xff]  ;;  %v747_v30 = vld [vmem:[#allocation2 + $0xd0] sm:$0xff] }
  0x15   :  { %89 = vadd.xlane.f32.xlu1 %v88_v10  ;;  %v741_v27 = vld [vmem:[#allocation2 + $0x48] sm:$0xff]  ;;  %v97_v28 = vadd.f32 %v737_v25, %v735_v24  ;;  %908 = vst [vmem:[#allocation9_spill] sm:$0xff] %v747_v30  ;;  %v749_v31 = vld [vmem:[#allocation2 + $0xd8] sm:$0xff]  ;;  %v751_v32 = vld [vmem:[#allocation2 + $0x50] sm:$0xff]  ;;  %v150_v10 = vand.u32 127, %v149_v63 }
  0x16   :  { %65 = vadd.xlane.f32.xlu0 %v64_v11  ;;  %v73_v29 = vadd.f32 %v741_v27, %v739_v26  ;;  %909 = vst [vmem:[#allocation10_spill] sm:$0xff] %v749_v31  ;;  %v753_v33 = vld [vmem:[#allocation2 + $0x58] sm:$0xff]  ;;  %v100_v34 = vadd.f32 %v749_v31, %v747_v30  ;;  %v759_v36 = vld [vmem:[#allocation2 + $0xe0] sm:$0xff]  ;;  %v761_v37 = vld [vmem:[#allocation2 + $0xe8] sm:$0xff] }
  0x17   :  { %v76_v35 = vadd.f32 %v753_v33, %v751_v32  ;;  %910 = vst [vmem:[#allocation11_spill] sm:$0xff] %v759_v36  ;;  %911 = vst [vmem:[#allocation12_spill] sm:$0xff] %v761_v37  ;;  %v763_v38 = vld [vmem:[#allocation2 + $0x60] sm:$0xff]  ;;  %v765_v39 = vld [vmem:[#allocation2 + $0x68] sm:$0xff]  ;;  %v103_v40 = vadd.f32 %v761_v37, %v759_v36 }
  0x18   :  { %v79_v41 = vadd.f32 %v765_v39, %v763_v38  ;;  %v771_v42 = vld [vmem:[#allocation2 + $0xf0] sm:$0xff]  ;;  %v773_v43 = vld [vmem:[#allocation2 + $0xf8] sm:$0xff]  ;;  %v130_v51 = vld [vmem:[%s896_s1 + $0x28] sm:$0xff] }
  0x19   :  { %92 = vadd.xlane.f32.xlu1 %v91_v16  ;;  %912 = vst [vmem:[#allocation13_spill] sm:$0xff] %v771_v42  ;;  %913 = vst [vmem:[#allocation14_spill] sm:$0xff] %v773_v43  ;;  %v775_v44 = vld [vmem:[#allocation2 + $0x70] sm:$0xff]  ;;  %v777_v45 = vld [vmem:[#allocation2 + $0x78] sm:$0xff]  ;;  %v106_v46 = vadd.f32 %v773_v43, %v771_v42  ;;  %v826_v16 = vshrl.u32 %v149_v63, 7 }
  0x1a   :  { %68 = vadd.xlane.f32.xlu0 %v67_v17  ;;  %v82_v47 = vadd.f32 %v777_v45, %v775_v44  ;;  %v132_v49 = vld [vmem:[%s896_s1 + $0x38] sm:$0xff]  ;;  %v131_v50 = vld [vmem:[%s896_s1 + $0x30] sm:$0xff]  ;;  %v129_v52 = vld [vmem:[%s896_s1 + $0x20] sm:$0xff] }
  0x1b   :  { %572 = vmatpush3.msra.mxu0 %v132_v49  ;;  %v128_v53 = vld [vmem:[%s896_s1 + $0x18] sm:$0xff]  ;;  %v127_v54 = vld [vmem:[%s896_s1 + $0x10] sm:$0xff]  ;;  %v126_v55 = vld [vmem:[%s896_s1 + $0x8] sm:$0xff]  ;;  %v190_v49 = vadd.s32 4294967248, %v150_v10 }
  0x1c   :  { %573 = vmatprep.subr.mxu0 %v899_v48  ;;  %v125_v56 = vld [vmem:[%s896_s1] sm:$0xff]  ;;  %v322_v57 = vld [vmem:[%s897_s2 + $0x18] sm:$0xff]  ;;  %v321_v58 = vld [vmem:[%s897_s2 + $0x10] sm:$0xff] }
  0x1d   :  { %95 = vadd.xlane.f32.xlu1 %v94_v22  ;;  %574 = vmatpush3.msra.mxu0 %v131_v50  ;;  %v155_v22 = vadd.s32 4294967288, %v150_v10 }
  0x1e   :  { %71 = vadd.xlane.f32.xlu0 %v70_v23  ;;  %575 = vmatprep.subr.mxu0 %v899_v48  ;;  %v162_v23 = vadd.s32 4294967280, %v150_v10 }
  0x1f   :  { %576 = vmatpush3.msra.mxu0 %v130_v51  ;;  %591 = vmatpush3.msra.mxu1 %v322_v57 }
  0x20   :  { %577 = vmatprep.subr.mxu0 %v899_v48  ;;  %592 = vmatprep.subr.mxu1 %v899_v48 }
  0x21   :  { %98 = vadd.xlane.f32.xlu1 %v97_v28  ;;  %578 = vmatpush3.msra.mxu0 %v129_v52  ;;  %v169_v28 = vadd.s32 4294967272, %v150_v10 }
  0x22   :  { %74 = vadd.xlane.f32.xlu0 %v73_v29  ;;  %579 = vmatprep.subr.mxu0 %v899_v48  ;;  %v176_v29 = vadd.s32 4294967264, %v150_v10 }
  0x23   :  { %580 = vmatpush3.msra.mxu0 %v128_v53  ;;  %593 = vmatpush3.msra.mxu1 %v321_v58  ;;  %v172_v51 = vsub.s32 %v169_v28, %v826_v16 }
  0x24   :  { %581 = vmatprep.subr.mxu0 %v899_v48  ;;  %594 = vmatprep.subr.mxu1 %v899_v48  ;;  %v179_v52 = vsub.s32 %v176_v29, %v826_v16  ;;  %v197_v29 = vadd.s32 4294967240, %v150_v10 }
  0x25   :  { %101 = vadd.xlane.f32.xlu1 %v100_v34  ;;  %582 = vmatpush3.msra.mxu0 %v127_v54 }
  0x26   :  { %77 = vadd.xlane.f32.xlu0 %v76_v35  ;;  %583 = vmatprep.subr.mxu0 %v899_v48  ;;  %v183_v35 = vadd.s32 4294967256, %v150_v10 }
  0x27   :  { %584 = vmatpush3.msra.mxu0 %v126_v55 }
  0x28   :  { %585 = vmatprep.subr.mxu0 %v899_v48  ;;  %v186_v55 = vsub.s32 %v183_v35, %v826_v16 }
  0x29   :  { %104 = vadd.xlane.f32.xlu1 %v103_v40  ;;  %586 = vmatpush3.msra.mxu0 %v125_v56  ;;  %v153_v40 = vsub.s32 %v150_v10, %v826_v16  ;;  %v200_v10 = vsub.s32 %v197_v29, %v826_v16  ;;  %v914_v29 = vmov 0.0  }
  0x2a   :  { %80 = vadd.xlane.f32.xlu0 %v79_v41 }
  0x2d   :  { %107 = vadd.xlane.f32.xlu1 %v106_v46  ;;  %v158_v46 = vsub.s32 %v155_v22, %v826_v16 }
  0x2e   :  { %83 = vadd.xlane.f32.xlu0 %v82_v47  ;;  %v165_v47 = vsub.s32 %v162_v23, %v826_v16 }
  0x9a   :  { %v87_v59 = vpop.xlane.xlu1 %86 }
  0x9b   :  { %v63_v60 = vpop.xlane.xlu0 %62  ;;  %v117_v57 = vmul.f32 0.00390625, %v87_v59 }
  0x9c   :  { %v109_v23 = vmul.f32 0.00390625, %v63_v60 }
  0x9d   :  { %v207_v37 = vrot.slane %v117_v57, %v153_v40 }
  0x9e   :  { %v90_v61 = vpop.xlane.xlu1 %89  ;;  %v154_v19 = vrot.slane %v109_v23, %v153_v40 }
  0x9f   :  { %v66_v62 = vpop.xlane.xlu0 %65  ;;  %v118_v50 = vmul.f32 0.00390625, %v90_v61  ;;  %v193_v61 = vsub.s32 %v190_v49, %v826_v16 }
  0xa0   :  { %v110_v53 = vmul.f32 0.00390625, %v66_v62 }
  0xa1   :  { %v211_v28 = vrot.slane %v118_v50, %v158_v46 }
  0xa2   :  { %v93_v3 = vpop.xlane.xlu1 %92  ;;  %v159_v62 = vrot.slane %v110_v53, %v158_v46 }
  0xa3   :  { %v69_v7 = vpop.xlane.xlu0 %68  ;;  %v119_v54 = vmul.f32 0.00390625, %v93_v3  ;;  %v212_v49 = vsel %vm160_vm1, %v211_v28, %v207_v37  ;;  %v320_v28 = vld [vmem:[%s897_s2 + $0x8] sm:$0xff] }
  0xa4   :  { %v111_v58 = vmul.f32 0.00390625, %v69_v7  ;;  %v161_v46 = vsel %vm160_vm1, %v159_v62, %v154_v19  ;;  %595 = vmatpush3.msra.mxu1 %v320_v28  ;;  %v319_v62 = vld [vmem:[%s897_s2] sm:$0xff]  ;;  %s660_s2 = smov [#allocation5]  }
  0xa5   :  { %v216_v3 = vrot.slane %v119_v54, %v165_v47  ;;  %596 = vmatprep.subr.mxu1 %v914_v29  ;;  %v917_v28 = vld [vmem:[#allocation12_spill] sm:$0xff]  ;;  %v919_v29 = vld [vmem:[#allocation10_spill] sm:$0xff]  ;;  %s542_s14 = sshll.u32 %s660_s2, 4  ;;  %s543_s14 = int_to_ptr.vmem [resolvable:$true] %s542_s14 }
  0xa6   :  { %v96_v11 = vpop.xlane.xlu1 %95  ;;  %v166_v59 = vrot.slane %v111_v58, %v165_v47  ;;  %597 = vmatpush3.msra.mxu1 %v319_v62  ;;  %s631_s17 = scalar_lea.vmem %s543_s14, 4096  ;;  %p636_p6 = scmp.lt.s32.totalorder %s543_s14, %s543_s14 }
  0xa7   :  { %v72_v17 = vpop.xlane.xlu0 %71  ;;  %v120_v63 = vmul.f32 0.00390625, %v96_v11  ;;  %v217_v53 = vsel %vm167_vm2, %v216_v3, %v212_v49  ;;  %v405_v49 = vsub.s32 0, %v826_v16  ;;  %p632_p5 = scmp.ne.s32.totalorder %s543_s14, %s631_s17  ;;  %p637_p7 = scmp.lt.s32.totalorder %s631_s17, %s631_s17 }
  0xa8   :  { %v112_v48 = vmul.f32 0.00390625, %v72_v17  ;;  %v168_v57 = vsel %vm167_vm2, %v166_v59, %v161_v46 }
  0xa9   :  { %v221_v7 = vrot.slane %v120_v63, %v172_v51  ;;  %p638_p8 = por %p637_p7, %p636_p6 }
  0xaa   :  { %v99_v34 = vpop.xlane.xlu1 %98  ;;  %v173_v60 = vrot.slane %v112_v48, %v172_v51 }
  0xab   :  { %v75_v41 = vpop.xlane.xlu0 %74  ;;  %v121_v43 = vmul.f32 0.00390625, %v99_v34  ;;  %v222_v40 = vsel %vm174_vm3, %v221_v7, %v217_v53  ;;  %p639_p9 = pnand %p638_p8, %p632_p5 }
  0xac   :  { %v113_v42 = vmul.f32 0.00390625, %v75_v41  ;;  %v175_v37 = vsel %vm174_vm3, %v173_v60, %v168_v57 }
  0xad   :  { %v226_v17 = vrot.slane %v121_v43, %v179_v52 }
  0xae   :  { %v102_v56 = vpop.xlane.xlu1 %101  ;;  %v180_v50 = vrot.slane %v113_v42, %v179_v52 }
  0xaf   :  { %v78_v22 = vpop.xlane.xlu0 %77  ;;  %v122_v31 = vmul.f32 0.00390625, %v102_v56 }
  0xb0   :  { %v114_v30 = vmul.f32 0.00390625, %v78_v22  ;;  %v182_v19 = vsel %vm181_vm4, %v180_v50, %v175_v37 }
  0xb1   :  { %v231_v41 = vrot.slane %v122_v31, %v186_v55  ;;  %v227_v31 = vsel %vm181_vm4, %v226_v17, %v222_v40 }
  0xb2   :  { %v105_v35 = vpop.xlane.xlu1 %104  ;;  %v187_v54 = vrot.slane %v114_v30, %v186_v55 }
  0xb3   :  { %v123_v11 = vmul.f32 0.00390625, %v105_v35  ;;  %v81_v36 = vpop.xlane.xlu0 %80  ;;  %v232_v51 = vsel %vm188_vm5, %v231_v41, %v227_v31 }
  0xb4   :  { %v115_v34 = vmul.f32 0.00390625, %v81_v36  ;;  %v189_v52 = vsel %vm188_vm5, %v187_v54, %v182_v19 }
  0xb5   :  { %v236_v56 = vrot.slane %v123_v11, %v193_v61 }
  0xb6   :  { %v108_v47 = vpop.xlane.xlu1 %107  ;;  %v194_v48 = vrot.slane %v115_v34, %v193_v61 }
  0xb7   :  { %v124_v43 = vmul.f32 0.00390625, %v108_v47  ;;  %v84_v36 = vpop.xlane.xlu0 %83  ;;  %v237_v55 = vsel %vm195_vm6, %v236_v56, %v232_v51 }
  0xb8   :  { %v116_v42 = vmul.f32 0.00390625, %v84_v36  ;;  %v196_v63 = vsel %vm195_vm6, %v194_v48, %v189_v52 }
  0xb9   :  { %v241_v30 = vrot.slane %v124_v43, %v200_v10 }
  0xba   :  { %v201_v58 = vrot.slane %v116_v42, %v200_v10  ;;  %v440_v10 = vsub.s32 1, %v826_v16 }
  0xbb   :  { %v242_v22 = vsel %vm202_vm7, %v241_v30, %v237_v55 }
  0xbc   :  { %v203_v23 = vsel %vm202_vm7, %v201_v58, %v196_v63  ;;  %v915_v63 = vld [vmem:[#allocation8_spill] sm:$0xff] }
  0xbd   :  { %v244_v61 = vsel %vm243_vm8, %v242_v22, %v203_v23  ;;  %v916_v23 = vld [vmem:[#allocation11_spill] sm:$0xff] }
  0xbe   :  { %588 = vmatmul.mubr.msk.f32.vlgmr.msra.gmra.mxu0 %vm245_vm9, %v244_v61 }
 0x17e   :  { %v314_v3 = vpop.f32.mrf.mxu0 }
 0x17f   :  { %v318_v35 = vmax.f32 %v314_v3, 0.0  ;;  %v920_v3 = vld [vmem:[#allocation13_spill] sm:$0xff] }
 0x180   :  { %v589_v59 = vpop.f32.mrf.mxu0 }
 0x181   :  { %599 = vmatmul.mubr.msk.f32.vlgmr.msra.gmra.mxu1 %vm323_vm10, %v318_v35  ;;  %v921_v59 = vld [vmem:[#allocation14_spill] sm:$0xff] }
 0x241   :  { %v393_v7 = vpop.f32.mrf.mxu1 }
 0x242   :  { %v556_v11 = vmul.f32 -1.442695, %v393_v7 }
 0x243   :  { %v600_v60 = vpop.f32.mrf.mxu1 }
 0x244   :  { %607 = vpow2.f32 %v556_v11 }
 0x251   :  { %v608_v17 = vpop.eup %607 }
 0x252   :  { %v400_v34 = vadd.f32 1.0, %v608_v17 }
 0x254   :  { %609 = vrcp.f32 %v400_v34 }
 0x261   :  { %v610_v50 = vpop.eup %609 }
 0x262   :  { %v406_v41 = vrot.slane %v610_v50, %v405_v49  ;;  %v441_v46 = vrot.slane %v610_v50, %v440_v10 }
 0x264   :  { %412 = vbcast.lane.b32.xlu1 %v406_v41, 264  ;;  %408 = vbcast.lane.b32.xlu0 %v406_v41, 256 }
 0x268   :  { %416 = vbcast.lane.b32.xlu1 %v406_v41, 272  ;;  %424 = vbcast.lane.b32.xlu0 %v406_v41, 288 }
 0x26c   :  { %420 = vbcast.lane.b32.xlu1 %v406_v41, 280  ;;  %432 = vbcast.lane.b32.xlu0 %v406_v41, 304 }
 0x270   :  { %428 = vbcast.lane.b32.xlu1 %v406_v41, 296  ;;  %443 = vbcast.lane.b32.xlu0 %v441_v46, 256 }
 0x274   :  { %436 = vbcast.lane.b32.xlu1 %v406_v41, 312  ;;  %451 = vbcast.lane.b32.xlu0 %v441_v46, 272 }
 0x278   :  { %447 = vbcast.lane.b32.xlu1 %v441_v46, 264  ;;  %459 = vbcast.lane.b32.xlu0 %v441_v46, 288 }
 0x27c   :  { %455 = vbcast.lane.b32.xlu1 %v441_v46, 280  ;;  %467 = vbcast.lane.b32.xlu0 %v441_v46, 304 }
 0x280   :  { %463 = vbcast.lane.b32.xlu1 %v441_v46, 296 }
 0x284   :  { %471 = vbcast.lane.b32.xlu1 %v441_v46, 312 }
 0x2d6   :  { %v413_v53 = vpop.permute.xlu1 %412  ;;  %v409_v54 = vpop.permute.xlu0 %408 }
 0x2d7   :  { %v475_v56 = vmul.f32 %v413_v53, %v703_v8  ;;  %v476_v47 = vmul.f32 %v413_v53, %v705_v9  ;;  %v473_v16 = vmul.f32 %v409_v54, %v691_v2  ;;  %v474_v57 = vmul.f32 %v409_v54, %v695_v4 }
 0x2d9   :  { %507 = vst [vmem:[#allocation5 + $0x10] sm:$0xff] %v475_v56  ;;  %508 = vst [vmem:[#allocation5 + $0x18] sm:$0xff] %v476_v47 }
 0x2da   :  { %505 = vst [vmem:[#allocation5] sm:$0xff] %v473_v16  ;;  %506 = vst [vmem:[#allocation5 + $0x8] sm:$0xff] %v474_v57  ;;  %v417_v40 = vpop.permute.xlu1 %416  ;;  %v425_v48 = vpop.permute.xlu0 %424 }
 0x2db   :  { %v477_v43 = vmul.f32 %v417_v40, %v715_v14  ;;  %v478_v36 = vmul.f32 %v417_v40, %v717_v15  ;;  %v481_v37 = vmul.f32 %v425_v48, %v739_v26  ;;  %v482_v8 = vmul.f32 %v425_v48, %v741_v27 }
 0x2dd   :  { %509 = vst [vmem:[#allocation5 + $0x20] sm:$0xff] %v477_v43  ;;  %510 = vst [vmem:[#allocation5 + $0x28] sm:$0xff] %v478_v36 }
 0x2de   :  { %513 = vst [vmem:[#allocation5 + $0x40] sm:$0xff] %v481_v37  ;;  %514 = vst [vmem:[#allocation5 + $0x48] sm:$0xff] %v482_v8  ;;  %v421_v2 = vpop.permute.xlu1 %420  ;;  %v433_v4 = vpop.permute.xlu0 %432 }
 0x2df   :  { %v479_v9 = vmul.f32 %v421_v2, %v727_v20  ;;  %v480_v31 = vmul.f32 %v421_v2, %v729_v21  ;;  %v485_v42 = vmul.f32 %v433_v4, %v763_v38  ;;  %v486_v14 = vmul.f32 %v433_v4, %v765_v39 }
 0x2e1   :  { %511 = vst [vmem:[#allocation5 + $0x30] sm:$0xff] %v479_v9  ;;  %512 = vst [vmem:[#allocation5 + $0x38] sm:$0xff] %v480_v31 }
 0x2e2   :  { %517 = vst [vmem:[#allocation5 + $0x60] sm:$0xff] %v485_v42  ;;  %518 = vst [vmem:[#allocation5 + $0x68] sm:$0xff] %v486_v14  ;;  %v429_v15 = vpop.permute.xlu1 %428  ;;  %v444_v26 = vpop.permute.xlu0 %443 }
 0x2e3   :  { %v483_v27 = vmul.f32 %v429_v15, %v751_v32  ;;  %v484_v19 = vmul.f32 %v429_v15, %v753_v33  ;;  %v489_v51 = vmul.f32 %v444_v26, %v687_v0  ;;  %v490_v20 = vmul.f32 %v444_v26, %v689_v1 }
 0x2e5   :  { %515 = vst [vmem:[#allocation5 + $0x50] sm:$0xff] %v483_v27  ;;  %516 = vst [vmem:[#allocation5 + $0x58] sm:$0xff] %v484_v19 }
 0x2e6   :  { %521 = vst [vmem:[#allocation5 + $0x80] sm:$0xff] %v489_v51  ;;  %522 = vst [vmem:[#allocation5 + $0x88] sm:$0xff] %v490_v20  ;;  %v437_v21 = vpop.permute.xlu1 %436  ;;  %v452_v38 = vpop.permute.xlu0 %451 }
 0x2e7   :  { %v487_v39 = vmul.f32 %v437_v21, %v775_v44  ;;  %v488_v30 = vmul.f32 %v437_v21, %v777_v45  ;;  %v493_v52 = vmul.f32 %v452_v38, %v711_v12  ;;  %v494_v32 = vmul.f32 %v452_v38, %v713_v13 }
 0x2e9   :  { %519 = vst [vmem:[#allocation5 + $0x70] sm:$0xff] %v487_v39  ;;  %520 = vst [vmem:[#allocation5 + $0x78] sm:$0xff] %v488_v30 }
 0x2ea   :  { %525 = vst [vmem:[#allocation5 + $0xa0] sm:$0xff] %v493_v52  ;;  %526 = vst [vmem:[#allocation5 + $0xa8] sm:$0xff] %v494_v32  ;;  %v448_v0 = vpop.permute.xlu1 %447  ;;  %v460_v1 = vpop.permute.xlu0 %459 }
 0x2eb   :  { %v491_v33 = vmul.f32 %v448_v0, %v697_v5  ;;  %v492_v55 = vmul.f32 %v448_v0, %v699_v6  ;;  %v497_v58 = vmul.f32 %v460_v1, %v735_v24  ;;  %v498_v44 = vmul.f32 %v460_v1, %v737_v25  ;;  %v918_v24 = vld [vmem:[#allocation9_spill] sm:$0xff] }
 0x2ed   :  { %523 = vst [vmem:[#allocation5 + $0x90] sm:$0xff] %v491_v33  ;;  %524 = vst [vmem:[#allocation5 + $0x98] sm:$0xff] %v492_v55 }
 0x2ee   :  { %529 = vst [vmem:[#allocation5 + $0xc0] sm:$0xff] %v497_v58  ;;  %530 = vst [vmem:[#allocation5 + $0xc8] sm:$0xff] %v498_v44  ;;  %v456_v12 = vpop.permute.xlu1 %455  ;;  %v468_v13 = vpop.permute.xlu0 %467 }
 0x2ef   :  { %v495_v45 = vmul.f32 %v456_v12, %v723_v18  ;;  %v496_v22 = vmul.f32 %v456_v12, %v915_v63  ;;  %v501_v61 = vmul.f32 %v468_v13, %v916_v23  ;;  %v502_v5 = vmul.f32 %v468_v13, %v917_v28 }
 0x2f1   :  { %527 = vst [vmem:[#allocation5 + $0xb0] sm:$0xff] %v495_v45  ;;  %528 = vst [vmem:[#allocation5 + $0xb8] sm:$0xff] %v496_v22 }
 0x2f2   :  { %533 = vst [vmem:[#allocation5 + $0xe0] sm:$0xff] %v501_v61  ;;  %534 = vst [vmem:[#allocation5 + $0xe8] sm:$0xff] %v502_v5  ;;  %v464_v6 = vpop.permute.xlu1 %463 }
 0x2f3   :  { %v499_v25 = vmul.f32 %v464_v6, %v918_v24  ;;  %v500_v62 = vmul.f32 %v464_v6, %v919_v29 }
 0x2f5   :  { %531 = vst [vmem:[#allocation5 + $0xd0] sm:$0xff] %v499_v25  ;;  %532 = vst [vmem:[#allocation5 + $0xd8] sm:$0xff] %v500_v62 }
 0x2f6   :  { %v472_v18 = vpop.permute.xlu1 %471 }
 0x2f7   :  { %v503_v35 = vmul.f32 %v472_v18, %v920_v3  ;;  %v504_v7 = vmul.f32 %v472_v18, %v921_v59 }
 0x2f9   :  { %535 = vst [vmem:[#allocation5 + $0xf0] sm:$0xff] %v503_v35  ;;  %536 = vst [vmem:[#allocation5 + $0xf8] sm:$0xff] %v504_v7 }
 0x2fa   :  { %642 = shalt.err (!%p639_p9)
}
 0x2fb   :  { %548 = dma.vmem_to_hbm [thread:$0]  %s543_s14, 4096, %s898_s3, [#allocation4], %s656_s15, %s656_s15, %s657_s16  }
 0x2fc   :  { %653 = dma.done.wait [#allocation4], 4096  }
 0x2fd   :  { %654 = vsyncadd [#allocation4], 4294963200 }
 0x2fe   :  { %552 = vsyncpa [#allocation3], 1 }
 0x2ff   :  { %553 = vsyncpa [#allocation4], 1 }

</bundles_post_ra>
